<compile_context>
chip_gen: v7x
topology: tpu7x:2x2x1
jax: 0.10.0
libtpu: 0.0.40
codegen_flags: <defaults>
</compile_context>

<pallas_src>
import functools

import jax
import jax.numpy as jnp
from jax import lax
from jax.experimental import pallas as pl
from jax.experimental.pallas import tpu as pltpu


# ---------------------------------------------------------------------------
# Path 1: depthwise (Cin_g == Cout_g == 1) — VPU multiply-accumulate,
#         channels on the lane axis.
# ---------------------------------------------------------------------------
def _depthwise_kernel(x_ref, w_ref, o_ref, *, KH, KW, H_out, W_out):
    # x_ref: (H_pad, W_pad, C_tile)   w_ref: (KH, KW, C_tile)
    # o_ref: (H_out, W_out, C_tile)
    w = w_ref[...].astype(jnp.float32)            # tiny; load once, reuse per tap
    acc = jnp.zeros(o_ref.shape, jnp.float32)
    for kh in range(KH):                          # small static filter window
        for kw in range(KW):
            patch = x_ref[kh:kh + H_out, kw:kw + W_out, :].astype(jnp.float32)
            wv = w[kh:kh + 1, kw:kw + 1, :]       # (1, 1, C_tile)
            acc = acc + patch * wv                # per-channel broadcast MAC (VPU)
    o_ref[...] = acc.astype(o_ref.dtype)


def _depthwise_forward(x, weight, KH, KW, padding):
    N, C, H, W = x.shape
    H_pad, W_pad = H + 2 * padding, W + 2 * padding
    H_out, W_out = H_pad - KH + 1, W_pad - KW + 1

    # NCHW -> NHWC (channels on lanes), spatial zero-pad once (in XLA, outside kernel).
    x_nhwc = jnp.transpose(x, (0, 2, 3, 1))
    x_p = jnp.pad(x_nhwc, ((0, 0), (padding, padding), (padding, padding), (0, 0)))
    # (C, 1, KH, KW) -> (KH, KW, C)
    w = jnp.transpose(weight.reshape(C, KH, KW), (1, 2, 0))

    # Tile channels in chunks of 128 lanes when they divide evenly.
    C_TILE = 128 if (C % 128 == 0) else C
    n_ct = C // C_TILE

    kern = functools.partial(_depthwise_kernel, KH=KH, KW=KW,
                             H_out=H_out, W_out=W_out)
    out = pl.pallas_call(
        kern,
        out_shape=jax.ShapeDtypeStruct((N, H_out, W_out, C), x.dtype),
        grid=(n_ct, N),   # channel tile outermost -> weight block constant over N
        in_specs=[
            pl.BlockSpec((pl.Squeezed(), H_pad, W_pad, C_TILE),
                         lambda c, n: (n, 0, 0, c)),
            pl.BlockSpec((KH, KW, C_TILE),
                         lambda c, n: (0, 0, c)),
        ],
        out_specs=pl.BlockSpec((pl.Squeezed(), H_out, W_out, C_TILE),
                               lambda c, n: (n, 0, 0, c)),
        compiler_params=pltpu.CompilerParams(
            dimension_semantics=("parallel", "parallel")),
    )(x_p, w)

    # NHWC -> NCHW
    return jnp.transpose(out, (0, 3, 1, 2))


# ---------------------------------------------------------------------------
# Paths 2 & 3: pointwise 1x1 (padding == 0) — MXU matmul.
# ---------------------------------------------------------------------------
def _pointwise_matmul_kernel(x_ref, w_ref, o_ref):
    # x_ref: (TM, Cin[_g])   w_ref: (Cin[_g], Cout[_g])   o_ref: (TM, Cout[_g])
    o_ref[...] = jnp.dot(x_ref[...], w_ref[...],
                         preferred_element_type=jnp.float32).astype(o_ref.dtype)


def _pick_row_tile(M, candidates=(1024, 512, 256, 128)):
    for cand in candidates:
        if M % cand == 0:
            return cand
    return M


def _pointwise_forward_dense(x, weight):
    # groups == 1: one big matmul over all N*H*W rows.
    N, Cin, H, W = x.shape
    Cout = weight.shape[0]
    M = N * H * W

    x2 = x.reshape(N, Cin, H * W).transpose(0, 2, 1).reshape(M, Cin)
    w2 = jnp.transpose(weight.reshape(Cout, Cin), (1, 0))   # (Cin, Cout)

    TM = _pick_row_tile(M)
    out = pl.pallas_call(
        _pointwise_matmul_kernel,
        out_shape=jax.ShapeDtypeStruct((M, Cout), x.dtype),
        grid=(M // TM,),
        in_specs=[
            pl.BlockSpec((TM, Cin), lambda m: (m, 0)),
            pl.BlockSpec((Cin, Cout), lambda m: (0, 0)),   # weight resident across tiles
        ],
        out_specs=pl.BlockSpec((TM, Cout), lambda m: (m, 0)),
        compiler_params=pltpu.CompilerParams(
            dimension_semantics=("parallel",)),
    )(x2, w2)

    return out.reshape(N, H * W, Cout).transpose(0, 2, 1).reshape(N, Cout, H, W)


def _pointwise_forward_grouped(x, weight, groups):
    N, Cin, H, W = x.shape
    Cout = weight.shape[0]
    Cin_g = Cin // groups
    Cout_g = Cout // groups
    M = H * W

    # NCHW -> (N, G, M, Cin_g): channel contraction on the lane axis, rows on sublanes.
    x_g = x.reshape(N, groups, Cin_g, M).transpose(0, 1, 3, 2)
    # (Cout, Cin_g, 1, 1) -> (G, Cin_g, Cout_g)
    w_g = weight.reshape(groups, Cout_g, Cin_g).transpose(0, 2, 1)

    TM = _pick_row_tile(M, candidates=(512, 256, 128))
    n_mt = M // TM

    out = pl.pallas_call(
        _pointwise_matmul_kernel,
        out_shape=jax.ShapeDtypeStruct((N, groups, M, Cout_g), x.dtype),
        grid=(groups, N, n_mt),  # group outermost -> weight block constant over (N, m)
        in_specs=[
            pl.BlockSpec((pl.Squeezed(), pl.Squeezed(), TM, Cin_g),
                         lambda g, n, m: (n, g, m, 0)),
            pl.BlockSpec((pl.Squeezed(), Cin_g, Cout_g),
                         lambda g, n, m: (g, 0, 0)),
        ],
        out_specs=pl.BlockSpec((pl.Squeezed(), pl.Squeezed(), TM, Cout_g),
                               lambda g, n, m: (n, g, m, 0)),
        compiler_params=pltpu.CompilerParams(
            dimension_semantics=("parallel", "parallel", "parallel")),
    )(x_g, w_g)

    # (N, G, M, Cout_g) -> NCHW
    return out.transpose(0, 1, 3, 2).reshape(N, Cout, H, W)


# ---------------------------------------------------------------------------
# Path 4: general grouped KxK fallback — per-tap MXU contraction, native dtype.
# ---------------------------------------------------------------------------
def _grouped_conv_kernel(x_ref, w_ref, o_ref, *, KH, KW, H_out, W_out, Cout_g):
    # x_ref: (H_pad, W_pad, Cin_g)  w_ref: (KH, KW, Cin_g, Cout_g)
    # o_ref: (H_out, W_out, Cout_g)
    acc = jnp.zeros((H_out, W_out, Cout_g), jnp.float32)
    for kh in range(KH):
        for kw in range(KW):
            patch = x_ref[kh:kh + H_out, kw:kw + W_out, :]   # native dtype -> MXU fast path
            wkk = w_ref[kh, kw, :, :]                        # (Cin_g, Cout_g)
            acc = acc + lax.dot_general(
                patch, wkk,
                dimension_numbers=(((2,), (0,)), ((), ())),
                preferred_element_type=jnp.float32,
            )
    o_ref[...] = acc.astype(o_ref.dtype)


def _grouped_forward(x, weight, KH, KW, padding, groups):
    N, Cin, H, W = x.shape
    Cout = weight.shape[0]
    Cin_g = Cin // groups
    Cout_g = Cout // groups
    H_pad, W_pad = H + 2 * padding, W + 2 * padding
    H_out, W_out = H_pad - KH + 1, W_pad - KW + 1

    # NCHW -> grouped NHWC, padded once outside the kernel.
    x_g = x.reshape(N, groups, Cin_g, H, W).transpose(0, 1, 3, 4, 2)
    x_p = jnp.pad(x_g, ((0, 0), (0, 0), (padding, padding), (padding, padding), (0, 0)))
    # OIHW -> (G, KH, KW, Cin_g, Cout_g)
    w_g = weight.reshape(groups, Cout_g, Cin_g, KH, KW).transpose(0, 3, 4, 2, 1)

    kern = functools.partial(_grouped_conv_kernel, KH=KH, KW=KW,
                             H_out=H_out, W_out=W_out, Cout_g=Cout_g)
    out = pl.pallas_call(
        kern,
        out_shape=jax.ShapeDtypeStruct((N, groups, H_out, W_out, Cout_g), x.dtype),
        grid=(groups, N),  # group outermost -> weight block constant over N
        in_specs=[
            pl.BlockSpec((pl.Squeezed(), pl.Squeezed(), H_pad, W_pad, Cin_g),
                         lambda g, n: (n, g, 0, 0, 0)),
            pl.BlockSpec((pl.Squeezed(), KH, KW, Cin_g, Cout_g),
                         lambda g, n: (g, 0, 0, 0, 0)),
        ],
        out_specs=pl.BlockSpec((pl.Squeezed(), pl.Squeezed(), H_out, W_out, Cout_g),
                               lambda g, n: (n, g, 0, 0, 0)),
        compiler_params=pltpu.CompilerParams(
            dimension_semantics=("parallel", "parallel")),
    )(x_p, w_g)

    return out.transpose(0, 1, 4, 2, 3).reshape(N, Cout, H_out, W_out)


# ---------------------------------------------------------------------------
# Public entry: matches nn.Conv2d(in_ch, out_ch, k, stride=1, padding, groups, bias=False)
# ---------------------------------------------------------------------------
def dwsc_unit_forward(x_nchw, weight_oihw, *, kernel_size, padding, groups):
    N, Cin, H, W = x_nchw.shape
    Cout = weight_oihw.shape[0]
    KH = KW = kernel_size
    Cin_g = Cin // groups
    Cout_g = Cout // groups

    if Cin_g == 1 and Cout_g == 1:
        # depthwise: groups == in_ch == out_ch
        return _depthwise_forward(x_nchw, weight_oihw, KH, KW, padding)
    if KH == 1 and KW == 1 and padding == 0:
        # pointwise 1x1
        if groups == 1:
            return _pointwise_forward_dense(x_nchw, weight_oihw)
        return _pointwise_forward_grouped(x_nchw, weight_oihw, groups)
    return _grouped_forward(x_nchw, weight_oihw, KH, KW, padding, groups)


def _reference_conv(x, w, padding, groups):
    return lax.conv_general_dilated(
        x, w,
        window_strides=(1, 1),
        padding=[(padding, padding), (padding, padding)],
        dimension_numbers=("NCHW", "OIHW", "NCHW"),
        feature_group_count=groups,
    )


if __name__ == "__main__":
    key = jax.random.PRNGKey(0)

    ok = True
    configs = [
        # depthwise 3x3 (groups == in_ch == out_ch)
        dict(in_ch=4, out_ch=4, kernel_size=3, padding=1, groups=4),
        # pointwise 1x1, dense (groups == 1)
        dict(in_ch=4, out_ch=8, kernel_size=1, padding=0, groups=1),
        # pointwise 1x1, grouped
        dict(in_ch=8, out_ch=16, kernel_size=1, padding=0, groups=2),
        # general grouped 3x3 fallback
        dict(in_ch=8, out_ch=8, kernel_size=3, padding=1, groups=2),
    ]
    for cfg in configs:
        kx, kwt, key = jax.random.split(key, 3)
        N, H, W = 2, 16, 16
        x = jax.random.normal(kx, (N, cfg["in_ch"], H, W), dtype=jnp.float32)
        # PyTorch Conv2d weight shape: (out_ch, in_ch // groups, KH, KW)
        wshape = (cfg["out_ch"], cfg["in_ch"] // cfg["groups"],
                  cfg["kernel_size"], cfg["kernel_size"])
        weight = 0.1 * jax.random.normal(kwt, wshape, dtype=jnp.float32)

        y = dwsc_unit_forward(
            x, weight,
            kernel_size=cfg["kernel_size"],
            padding=cfg["padding"],
            groups=cfg["groups"],
        )
        y = jax.block_until_ready(y)

        y_ref = _reference_conv(x, weight, cfg["padding"], cfg["groups"])
        if not jnp.allclose(y, y_ref, atol=1e-4, rtol=1e-4):
            ok = False

    if ok:
        print("KERNEL_OK")
    else:
        print("KERNEL_MISMATCH")
</pallas_src>

<mosaic_0001>
module attributes {stable_mosaic.version = 11 : i64} {
  func.func @_depthwise_kernel(%arg0: i32, %arg1: i32, %arg2: memref<1x18x18x4xf32, #tpu.memory_space<vmem>>, %arg3: memref<3x3x4xf32, #tpu.memory_space<vmem>>, %arg4: memref<1x16x16x4xf32, #tpu.memory_space<vmem>>) attributes {dimension_semantics = [#tpu.dimension_semantics<parallel>, #tpu.dimension_semantics<parallel>], iteration_bounds = array<i64: 1, 2>, scalar_prefetch = 0 : i64, scratch_operands = 0 : i64, tpu.core_type = #tpu.core_type<tc>, window_params = [{transform_indices = @transform_0, window_bounds = array<i64: 1, 18, 18, 4>}, {transform_indices = @transform_1, window_bounds = array<i64: 3, 3, 4>}, {transform_indices = @transform_2, window_bounds = array<i64: 1, 16, 16, 4>}]} {
    %c0 = arith.constant 0 : index
    %c0_0 = arith.constant 0 : index
    %c0_1 = arith.constant 0 : index
    %0 = vector.load %arg3[%c0, %c0_0, %c0_1] : memref<3x3x4xf32, #tpu.memory_space<vmem>>, vector<3x3x4xf32>
    %cst = arith.constant 0.000000e+00 : f32
    %1 = vector.broadcast %cst : f32 to vector<16x16x4xf32>
    %c0_2 = arith.constant 0 : index
    %c0_3 = arith.constant 0 : index
    %c0_4 = arith.constant 0 : index
    %c0_5 = arith.constant 0 : index
    %2 = vector.load %arg2[%c0_2, %c0_3, %c0_4, %c0_5] : memref<1x18x18x4xf32, #tpu.memory_space<vmem>>, vector<1x16x16x4xf32>
    %3 = vector.shape_cast %2 : vector<1x16x16x4xf32> to vector<16x16x4xf32>
    %4 = vector.extract_strided_slice %0 {offsets = [0, 0, 0], sizes = [1, 1, 4], strides = [1, 1, 1]} : vector<3x3x4xf32> to vector<1x1x4xf32>
    %5 = vector.broadcast %4 : vector<1x1x4xf32> to vector<16x16x4xf32>
    %6 = arith.mulf %3, %5 : vector<16x16x4xf32>
    %7 = arith.addf %1, %6 : vector<16x16x4xf32>
    %c0_6 = arith.constant 0 : index
    %c0_7 = arith.constant 0 : index
    %c1 = arith.constant 1 : index
    %c0_8 = arith.constant 0 : index
    %8 = vector.load %arg2[%c0_6, %c0_7, %c1, %c0_8] : memref<1x18x18x4xf32, #tpu.memory_space<vmem>>, vector<1x16x16x4xf32>
    %9 = vector.shape_cast %8 : vector<1x16x16x4xf32> to vector<16x16x4xf32>
    %10 = vector.extract_strided_slice %0 {offsets = [0, 1, 0], sizes = [1, 1, 4], strides = [1, 1, 1]} : vector<3x3x4xf32> to vector<1x1x4xf32>
    %11 = vector.broadcast %10 : vector<1x1x4xf32> to vector<16x16x4xf32>
    %12 = arith.mulf %9, %11 : vector<16x16x4xf32>
    %13 = arith.addf %7, %12 : vector<16x16x4xf32>
    %c0_9 = arith.constant 0 : index
    %c0_10 = arith.constant 0 : index
    %c2 = arith.constant 2 : index
    %c0_11 = arith.constant 0 : index
    %14 = vector.load %arg2[%c0_9, %c0_10, %c2, %c0_11] : memref<1x18x18x4xf32, #tpu.memory_space<vmem>>, vector<1x16x16x4xf32>
    %15 = vector.shape_cast %14 : vector<1x16x16x4xf32> to vector<16x16x4xf32>
    %16 = vector.extract_strided_slice %0 {offsets = [0, 2, 0], sizes = [1, 1, 4], strides = [1, 1, 1]} : vector<3x3x4xf32> to vector<1x1x4xf32>
    %17 = vector.broadcast %16 : vector<1x1x4xf32> to vector<16x16x4xf32>
    %18 = arith.mulf %15, %17 : vector<16x16x4xf32>
    %19 = arith.addf %13, %18 : vector<16x16x4xf32>
    %c0_12 = arith.constant 0 : index
    %c1_13 = arith.constant 1 : index
    %c0_14 = arith.constant 0 : index
    %c0_15 = arith.constant 0 : index
    %20 = vector.load %arg2[%c0_12, %c1_13, %c0_14, %c0_15] : memref<1x18x18x4xf32, #tpu.memory_space<vmem>>, vector<1x16x16x4xf32>
    %21 = vector.shape_cast %20 : vector<1x16x16x4xf32> to vector<16x16x4xf32>
    %22 = vector.extract_strided_slice %0 {offsets = [1, 0, 0], sizes = [1, 1, 4], strides = [1, 1, 1]} : vector<3x3x4xf32> to vector<1x1x4xf32>
    %23 = vector.broadcast %22 : vector<1x1x4xf32> to vector<16x16x4xf32>
    %24 = arith.mulf %21, %23 : vector<16x16x4xf32>
    %25 = arith.addf %19, %24 : vector<16x16x4xf32>
    %c0_16 = arith.constant 0 : index
    %c1_17 = arith.constant 1 : index
    %c1_18 = arith.constant 1 : index
    %c0_19 = arith.constant 0 : index
    %26 = vector.load %arg2[%c0_16, %c1_17, %c1_18, %c0_19] : memref<1x18x18x4xf32, #tpu.memory_space<vmem>>, vector<1x16x16x4xf32>
    %27 = vector.shape_cast %26 : vector<1x16x16x4xf32> to vector<16x16x4xf32>
    %28 = vector.extract_strided_slice %0 {offsets = [1, 1, 0], sizes = [1, 1, 4], strides = [1, 1, 1]} : vector<3x3x4xf32> to vector<1x1x4xf32>
    %29 = vector.broadcast %28 : vector<1x1x4xf32> to vector<16x16x4xf32>
    %30 = arith.mulf %27, %29 : vector<16x16x4xf32>
    %31 = arith.addf %25, %30 : vector<16x16x4xf32>
    %c0_20 = arith.constant 0 : index
    %c1_21 = arith.constant 1 : index
    %c2_22 = arith.constant 2 : index
    %c0_23 = arith.constant 0 : index
    %32 = vector.load %arg2[%c0_20, %c1_21, %c2_22, %c0_23] : memref<1x18x18x4xf32, #tpu.memory_space<vmem>>, vector<1x16x16x4xf32>
    %33 = vector.shape_cast %32 : vector<1x16x16x4xf32> to vector<16x16x4xf32>
    %34 = vector.extract_strided_slice %0 {offsets = [1, 2, 0], sizes = [1, 1, 4], strides = [1, 1, 1]} : vector<3x3x4xf32> to vector<1x1x4xf32>
    %35 = vector.broadcast %34 : vector<1x1x4xf32> to vector<16x16x4xf32>
    %36 = arith.mulf %33, %35 : vector<16x16x4xf32>
    %37 = arith.addf %31, %36 : vector<16x16x4xf32>
    %c0_24 = arith.constant 0 : index
    %c2_25 = arith.constant 2 : index
    %c0_26 = arith.constant 0 : index
    %c0_27 = arith.constant 0 : index
    %38 = vector.load %arg2[%c0_24, %c2_25, %c0_26, %c0_27] : memref<1x18x18x4xf32, #tpu.memory_space<vmem>>, vector<1x16x16x4xf32>
    %39 = vector.shape_cast %38 : vector<1x16x16x4xf32> to vector<16x16x4xf32>
    %40 = vector.extract_strided_slice %0 {offsets = [2, 0, 0], sizes = [1, 1, 4], strides = [1, 1, 1]} : vector<3x3x4xf32> to vector<1x1x4xf32>
    %41 = vector.broadcast %40 : vector<1x1x4xf32> to vector<16x16x4xf32>
    %42 = arith.mulf %39, %41 : vector<16x16x4xf32>
    %43 = arith.addf %37, %42 : vector<16x16x4xf32>
    %c0_28 = arith.constant 0 : index
    %c2_29 = arith.constant 2 : index
    %c1_30 = arith.constant 1 : index
    %c0_31 = arith.constant 0 : index
    %44 = vector.load %arg2[%c0_28, %c2_29, %c1_30, %c0_31] : memref<1x18x18x4xf32, #tpu.memory_space<vmem>>, vector<1x16x16x4xf32>
    %45 = vector.shape_cast %44 : vector<1x16x16x4xf32> to vector<16x16x4xf32>
    %46 = vector.extract_strided_slice %0 {offsets = [2, 1, 0], sizes = [1, 1, 4], strides = [1, 1, 1]} : vector<3x3x4xf32> to vector<1x1x4xf32>
    %47 = vector.broadcast %46 : vector<1x1x4xf32> to vector<16x16x4xf32>
    %48 = arith.mulf %45, %47 : vector<16x16x4xf32>
    %49 = arith.addf %43, %48 : vector<16x16x4xf32>
    %c0_32 = arith.constant 0 : index
    %c2_33 = arith.constant 2 : index
    %c2_34 = arith.constant 2 : index
    %c0_35 = arith.constant 0 : index
    %50 = vector.load %arg2[%c0_32, %c2_33, %c2_34, %c0_35] : memref<1x18x18x4xf32, #tpu.memory_space<vmem>>, vector<1x16x16x4xf32>
    %51 = vector.shape_cast %50 : vector<1x16x16x4xf32> to vector<16x16x4xf32>
    %52 = vector.extract_strided_slice %0 {offsets = [2, 2, 0], sizes = [1, 1, 4], strides = [1, 1, 1]} : vector<3x3x4xf32> to vector<1x1x4xf32>
    %53 = vector.broadcast %52 : vector<1x1x4xf32> to vector<16x16x4xf32>
    %54 = arith.mulf %51, %53 : vector<16x16x4xf32>
    %55 = arith.addf %49, %54 : vector<16x16x4xf32>
    %c0_36 = arith.constant 0 : index
    %c0_37 = arith.constant 0 : index
    %c0_38 = arith.constant 0 : index
    %c0_39 = arith.constant 0 : index
    %56 = vector.load %arg4[%c0_36, %c0_37, %c0_38, %c0_39] : memref<1x16x16x4xf32, #tpu.memory_space<vmem>>, vector<1x16x16x4xf32>
    %57 = vector.shape_cast %56 : vector<1x16x16x4xf32> to vector<16x16x4xf32>
    %58 = vector.shape_cast %55 : vector<16x16x4xf32> to vector<1x16x16x4xf32>
    tpu.vector_store %arg4[%c0_36, %c0_37, %c0_38, %c0_39], %58 {strides = array<i32>} : memref<1x16x16x4xf32, #tpu.memory_space<vmem>>, vector<1x16x16x4xf32>,
    return
  }
  func.func @transform_0(%arg0: i32, %arg1: i32) -> (i32, i32, i32, i32) {
    %c0_i32 = arith.constant 0 : i32
    %c0_i32_0 = arith.constant 0 : i32
    %c0_i32_1 = arith.constant 0 : i32
    return %arg1, %c0_i32, %c0_i32_0, %arg0 : i32, i32, i32, i32
  }
  func.func @transform_1(%arg0: i32, %arg1: i32) -> (i32, i32, i32) {
    %c0_i32 = arith.constant 0 : i32
    %c0_i32_0 = arith.constant 0 : i32
    %c0_i32_1 = arith.constant 0 : i32
    return %c0_i32, %c0_i32_0, %arg0 : i32, i32, i32
  }
  func.func @transform_2(%arg0: i32, %arg1: i32) -> (i32, i32, i32, i32) {
    %c0_i32 = arith.constant 0 : i32
    %c0_i32_0 = arith.constant 0 : i32
    %c0_i32_1 = arith.constant 0 : i32
    return %arg1, %c0_i32, %c0_i32_0, %arg0 : i32, i32, i32, i32
  }
}

</mosaic_0001>

<bundles_post_ra>
// kernel: tpu_custom_call.1
= control target key start
LH: loop header
LB: loop body
LE: loop exit
PB: predicated region body
PF: predicated region fallthrough
CT: control target
= control target key end

     0   :  { %s1497_s9 = smov 0   ;;  %s1499_s10 = smov 0   ;;  %s2030_s0 = inlined_call_operand.vmem [shape: f32[2,18,18,4], index: 0, kind: input, shape index: {}]   ;;  %s2031_s1 = inlined_call_operand.vmem [shape: f32[3,3,4], index: 1, kind: input, shape index: {}]   ;;  %s2032_s2 = inlined_call_operand.vmem [shape: f32[2,16,16,4], index: 2, kind: output, shape index: {}]  }
   0x1   :  { %s1501_s11 = smov 0  }
   0x2 LB: > { %s21_s12 = sadd.s32 1, %s1476_s10  ;;  %p1234_p0 = scmp.ge.s32.totalorder %s1480_s11, 1  ;;  %s1480_s11 = sphi %s1501_s11, %s12_s11   ;;  %s1476_s10 = sphi %s1499_s10, %s2034_s10   ;;  %s1472_s9 = sphi %s1497_s9, %s2033_s9  }
   0x3   : > { %p22_p1 = scmp.ge.s32.totalorder %s21_s12, 2  ;;  %p140_p2 = scmp.lt.s32.totalorder %s1480_s11, 3 }
   0x5   : > { %s2036_s12 = smov (%p22_p1, %s21_s12), 0  ;;  %p141_p3 = pnand %p1234_p0, %p140_p2 }
   0x6   : > { %p172_p4 = scmp.lt.s32.totalorder (!%p141_p3), %s1472_s9, 1  ;;  %v227_v0 = vlaneseq (!%p141_p3)  ;;  %v192_v2 = vld [vmem:[%s2031_s1] sm:$0x7] (!%p141_p3)  ;;  %v193_v3 = vld [vmem:[%s2031_s1 + $0x4] sm:$0x7] (!%p141_p3)  ;;  %vm1097_vm0 = vcmask (!%p141_p3), 31744  }
   0x7   : > { %144 = sbr.rel (%p141_p3) target bundleno = 165 (0xa5), region = 28  ;;  %v194_v4 = vld [vmem:[%s2031_s1 + $0x8] sm:$0x7] (!%p141_p3) }
   0x8   : > { %v228_v1 = vshrl.u32 (!%p141_p3), %v227_v0, 7 }
   0xa   : > { %v229_v5 = vsub.s32 (!%p141_p3), 0, %v228_v1  ;;  %v329_v6 = vsub.s32 (!%p141_p3), 1, %v228_v1  ;;  %v429_v7 = vsub.s32 (!%p141_p3), 2, %v228_v1 }
   0xc   : > { %v1532_v8 = vrot.slane (!%p141_p3), %v192_v2, %v229_v5  ;;  %v1534_v9 = vrot.slane (!%p141_p3), %v192_v2, %v329_v6  ;;  %v1536_v10 = vrot.slane (!%p141_p3), %v192_v2, %v429_v7  ;;  %v1538_v11 = vrot.slane (!%p141_p3), %v193_v3, %v229_v5 }
   0xd   : > { %v1543_v15 = vrot.slane (!%p141_p3), %v193_v3, %v329_v6  ;;  %v1545_v16 = vrot.slane (!%p141_p3), %v193_v3, %v429_v7  ;;  %v1547_v17 = vrot.slane (!%p141_p3), %v194_v4, %v229_v5  ;;  %v1554_v23 = vrot.slane (!%p141_p3), %v194_v4, %v329_v6 }
   0xe   : > { %s2038_s9 = smov (!%p172_p4, %s1472_s9), 1  ;;  %v1556_v24 = vrot.slane %v194_v4, %v429_v7 }
   0xf   : > { %s1433_s17 = smul.u32 432, %s2038_s9  ;;  %s1432_s23 = sshll.u32 %s2038_s9, 8 }
  0x10   : > { %s1614_s26 = scalar_lea.vmem %s2032_s2, %s1432_s23 }
  0x11   : > { %s1530_s22 = scalar_lea.vmem %s2030_s0, %s1433_s17 }
  0x12   : > { %v195_v12 = vld [vmem:[%s1530_s22] sm:$0xff]  ;;  %v1238_v21 = vld [vmem:[%s1530_s22 + $0x18] sm:$0xff]  ;;  %v196_v28 = vld [vmem:[%s1530_s22 + $0x8] sm:$0xff] }
  0x13   : > { %v295_v13 = vld [vmem:[%s1530_s22 + $0x1] sm:$0xff]  ;;  %v231_v18 = vmul.f32 %v1532_v8, %v195_v12  ;;  %v1270_v22 = vld [vmem:[%s1530_s22 + $0x19] sm:$0xff]  ;;  %v532_v26 = vmul.f32 %v1238_v21, %v1538_v11  ;;  %v296_v29 = vld [vmem:[%s1530_s22 + $0x9] sm:$0xff]  ;;  %v233_v31 = vmul.f32 %v1238_v21, %v1532_v8  ;;  %v232_v35 = vmul.f32 %v1532_v8, %v196_v28 }
  0x14   : > { %v395_v14 = vld [vmem:[%s1530_s22 + $0x2] sm:$0xff]  ;;  %v331_v19 = vmul.f32 %v1534_v9, %v295_v13  ;;  %v632_v27 = vmul.f32 %v1270_v22, %v1543_v15  ;;  %v396_v30 = vld [vmem:[%s1530_s22 + $0xa] sm:$0xff]  ;;  %v1302_v32 = vld [vmem:[%s1530_s22 + $0x1a] sm:$0xff]  ;;  %v332_v36 = vmul.f32 %v1534_v9, %v296_v29  ;;  %v333_v38 = vmul.f32 %v1270_v22, %v1534_v9 }
  0x15   : > { %v431_v20 = vmul.f32 %v1536_v10, %v395_v14  ;;  %v1334_v33 = vld [vmem:[%s1530_s22 + $0x30] sm:$0xff]  ;;  %v432_v37 = vmul.f32 %v1536_v10, %v396_v30  ;;  %v732_v40 = vmul.f32 %v1302_v32, %v1545_v16  ;;  %v1239_v44 = vld [vmem:[%s1530_s22 + $0x20] sm:$0xff]  ;;  %v1335_v52 = vld [vmem:[%s1530_s22 + $0x38] sm:$0xff]  ;;  %v433_v55 = vmul.f32 %v1302_v32, %v1536_v10 }
  0x16   : > { %v363_v25 = vadd.f32 %v331_v19, %v231_v18  ;;  %v1366_v34 = vld [vmem:[%s1530_s22 + $0x31] sm:$0xff]  ;;  %v833_v41 = vmul.f32 %v1334_v33, %v1547_v17  ;;  %v1271_v45 = vld [vmem:[%s1530_s22 + $0x21] sm:$0xff]  ;;  %v364_v47 = vadd.f32 %v332_v36, %v232_v35  ;;  %v533_v48 = vmul.f32 %v1239_v44, %v1538_v11  ;;  %v1367_v53 = vld [vmem:[%s1530_s22 + $0x39] sm:$0xff] }
  0x17   : > { %v933_v42 = vmul.f32 %v1366_v34, %v1554_v23  ;;  %v1398_v43 = vld [vmem:[%s1530_s22 + $0x32] sm:$0xff]  ;;  %v633_v49 = vmul.f32 %v1271_v45, %v1543_v15  ;;  %v1303_v51 = vld [vmem:[%s1530_s22 + $0x22] sm:$0xff]  ;;  %v365_v54 = vadd.f32 %v333_v38, %v233_v31  ;;  %v534_v56 = vmul.f32 %v1334_v33, %v1538_v11  ;;  %v1399_v61 = vld [vmem:[%s1530_s22 + $0x3a] sm:$0xff] }
  0x18   : > { %v463_v39 = vadd.f32 %v431_v20, %v363_v25  ;;  %v1033_v46 = vmul.f32 %v1398_v43, %v1556_v24  ;;  %v464_v57 = vadd.f32 %v432_v37, %v364_v47  ;;  %v733_v58 = vmul.f32 %v1303_v51, %v1545_v16  ;;  %v1592_v3 = vld [vmem:[%s1530_s22 + $0x48] sm:$0xff] }
  0x19   : > { %v834_v59 = vmul.f32 %v1335_v52, %v1547_v17  ;;  %v934_v60 = vmul.f32 %v1367_v53, %v1554_v23  ;;  %v1034_v63 = vmul.f32 %v1399_v61, %v1556_v24  ;;  %v465_v0 = vadd.f32 %v433_v55, %v365_v54  ;;  %v1368_v18 = vld [vmem:[%s1530_s22 + $0x49] sm:$0xff] }
  0x1a   : > { %v564_v50 = vadd.f32 %v532_v26, %v463_v39  ;;  %v634_v1 = vmul.f32 %v1366_v34, %v1543_v15  ;;  %v565_v2 = vadd.f32 %v533_v48, %v464_v57  ;;  %v234_v4 = vmul.f32 %v1239_v44, %v1532_v8  ;;  %v1400_v21 = vld [vmem:[%s1530_s22 + $0x4a] sm:$0xff] }
  0x1b   : > { %v334_v5 = vmul.f32 %v1271_v45, %v1534_v9  ;;  %v434_v6 = vmul.f32 %v1303_v51, %v1536_v10  ;;  %v566_v12 = vadd.f32 %v534_v56, %v465_v0  ;;  %v734_v13 = vmul.f32 %v1398_v43, %v1545_v16  ;;  %v1337_v44 = vld [vmem:[%s1530_s22 + $0x50] sm:$0xff] }
  0x1c   : > { %v664_v62 = vadd.f32 %v632_v27, %v564_v50  ;;  %v835_v14 = vmul.f32 %v1592_v3, %v1547_v17  ;;  %v665_v19 = vadd.f32 %v633_v49, %v565_v2  ;;  %v935_v20 = vmul.f32 %v1368_v18, %v1554_v23  ;;  %v1369_v45 = vld [vmem:[%s1530_s22 + $0x51] sm:$0xff]  ;;  %v1338_v2 = vld [vmem:[%s1530_s22 + $0x60] sm:$0xff] }
  0x1d   : > { %v366_v22 = vadd.f32 %v334_v5, %v234_v4  ;;  %v535_v25 = vmul.f32 %v1335_v52, %v1538_v11  ;;  %v666_v27 = vadd.f32 %v634_v1, %v566_v12  ;;  %v1035_v28 = vmul.f32 %v1400_v21, %v1556_v24  ;;  %v1401_v1 = vld [vmem:[%s1530_s22 + $0x52] sm:$0xff] }
  0x1e   : > { %v764_v7 = vadd.f32 %v732_v40, %v664_v62  ;;  %v635_v29 = vmul.f32 %v1367_v53, %v1543_v15  ;;  %v765_v30 = vadd.f32 %v733_v58, %v665_v19  ;;  %v235_v32 = vmul.f32 %v1334_v33, %v1532_v8 }
  0x1f   : > { %v466_v31 = vadd.f32 %v434_v6, %v366_v22  ;;  %v335_v35 = vmul.f32 %v1366_v34, %v1534_v9  ;;  %v766_v37 = vadd.f32 %v734_v13, %v666_v27  ;;  %v735_v38 = vmul.f32 %v1399_v61, %v1545_v16  ;;  %v1402_v22 = vld [vmem:[%s1530_s22 + $0x62] sm:$0xff] }
  0x20   : > { %v865_v26 = vadd.f32 %v833_v41, %v764_v7  ;;  %v435_v39 = vmul.f32 %v1398_v43, %v1536_v10  ;;  %v866_v40 = vadd.f32 %v834_v59, %v765_v30  ;;  %v536_v33 = vmul.f32 %v1592_v3, %v1538_v11 }
  0x21   : > { %v567_v41 = vadd.f32 %v535_v25, %v466_v31  ;;  %v367_v47 = vadd.f32 %v335_v35, %v235_v32  ;;  %v836_v48 = vmul.f32 %v1337_v44, %v1547_v17  ;;  %v936_v43 = vmul.f32 %v1369_v45, %v1554_v23  ;;  %v1339_v32 = vld [vmem:[%s1530_s22 + $0x68] sm:$0xff] }
  0x22   : > { %v965_v36 = vadd.f32 %v933_v42, %v865_v26  ;;  %v867_v42 = vadd.f32 %v835_v14, %v766_v37  ;;  %v966_v49 = vadd.f32 %v934_v60, %v866_v40  ;;  %v636_v54 = vmul.f32 %v1368_v18, %v1543_v15  ;;  %v1403_v40 = vld [vmem:[%s1530_s22 + $0x6a] sm:$0xff] }
  0x23   : > { %v667_v50 = vadd.f32 %v635_v29, %v567_v41  ;;  %v467_v51 = vadd.f32 %v435_v39, %v367_v47  ;;  %v736_v56 = vmul.f32 %v1400_v21, %v1545_v16  ;;  %v336_v57 = vmul.f32 %v1367_v53, %v1534_v9  ;;  %v1371_v39 = vld [vmem:[%s1530_s22 + $0x69] sm:$0xff] }
  0x24   : > { %v1065_v34 = vadd.f32 %v1033_v46, %v965_v36  ;;  %v967_v55 = vadd.f32 %v935_v20, %v867_v42  ;;  %v236_v46 = vmul.f32 %v1335_v52, %v1532_v8  ;;  %v1066_v58 = vadd.f32 %v1034_v63, %v966_v49  ;;  %v1370_v63 = vld [vmem:[%s1530_s22 + $0x61] sm:$0xff] }
  0x25   : > { %v767_v59 = vadd.f32 %v735_v38, %v667_v50  ;;  %v568_v62 = vadd.f32 %v536_v33, %v467_v51  ;;  %v436_v60 = vmul.f32 %v1399_v61, %v1536_v10  ;;  %v537_v5 = vmul.f32 %v1337_v44, %v1538_v11  ;;  %v1340_v50 = vld [vmem:[%s1530_s22 + $0x78] sm:$0xff] }
  0x26   : > { %1098 = vst.msk [vmem:[%s1614_s26] sm:$0xff] %vm1097_vm0, %v1065_v34  ;;  %v1067_v0 = vadd.f32 %v1035_v28, %v967_v55  ;;  %v368_v4 = vadd.f32 %v336_v57, %v236_v46  ;;  %1099 = vst.msk [vmem:[%s1614_s26 + $0x8] sm:$0xff] %vm1097_vm0, %v1066_v58  ;;  %v1036_v52 = vmul.f32 %v1401_v1, %v1556_v24  ;;  %v1372_v58 = vld [vmem:[%s1530_s22 + $0x79] sm:$0xff] }
  0x27   : > { %v868_v6 = vadd.f32 %v836_v48, %v767_v59  ;;  %v668_v7 = vadd.f32 %v636_v54, %v568_v62  ;;  %v837_v53 = vmul.f32 %v1338_v2, %v1547_v17  ;;  %v937_v61 = vmul.f32 %v1370_v63, %v1554_v23  ;;  %v1404_v59 = vld [vmem:[%s1530_s22 + $0x7a] sm:$0xff] }
  0x28   : > { %1100 = vst.msk [vmem:[%s1614_s26 + $0x10] sm:$0xff] %vm1097_vm0, %v1067_v0  ;;  %v468_v12 = vadd.f32 %v436_v60, %v368_v4  ;;  %v637_v13 = vmul.f32 %v1369_v45, %v1543_v15  ;;  %v237_v14 = vmul.f32 %v1592_v3, %v1532_v8  ;;  %v337_v25 = vmul.f32 %v1368_v18, %v1534_v9 }
  0x29   : > { %v968_v19 = vadd.f32 %v936_v43, %v868_v6  ;;  %v768_v20 = vadd.f32 %v736_v56, %v668_v7  ;;  %v437_v26 = vmul.f32 %v1400_v21, %v1536_v10  ;;  %v1037_v27 = vmul.f32 %v1402_v22, %v1556_v24  ;;  %v1341_v7 = vld [vmem:[%s1530_s22 + $0x80] sm:$0xff] }
  0x2a   : > { %v569_v28 = vadd.f32 %v537_v5, %v468_v12  ;;  %v737_v29 = vmul.f32 %v1401_v1, %v1545_v16  ;;  %v369_v35 = vadd.f32 %v337_v25, %v237_v14  ;;  %v538_v3 = vmul.f32 %v1338_v2, %v1538_v11 }
  0x2b   : > { %v1068_v30 = vadd.f32 %v1036_v52, %v968_v19  ;;  %v869_v31 = vadd.f32 %v837_v53, %v768_v20  ;;  %v838_v37 = vmul.f32 %v1339_v32, %v1547_v17  ;;  %v638_v18 = vmul.f32 %v1370_v63, %v1543_v15 }
  0x2c   : > { %v669_v36 = vadd.f32 %v637_v13, %v569_v28  ;;  %v238_v21 = vmul.f32 %v1337_v44, %v1532_v8  ;;  %v469_v41 = vadd.f32 %v437_v26, %v369_v35  ;;  %v338_v47 = vmul.f32 %v1369_v45, %v1534_v9  ;;  %v1405_v35 = vld [vmem:[%s1530_s22 + $0x82] sm:$0xff] }
  0x2d   : > { %1101 = vst.msk [vmem:[%s1614_s26 + $0x18] sm:$0xff] %vm1097_vm0, %v1068_v30  ;;  %v969_v38 = vadd.f32 %v937_v61, %v869_v31  ;;  %v438_v33 = vmul.f32 %v1401_v1, %v1536_v10  ;;  %v938_v42 = vmul.f32 %v1371_v39, %v1554_v23  ;;  %v1038_v48 = vmul.f32 %v1403_v40, %v1556_v24 }
  0x2e   : > { %v769_v34 = vadd.f32 %v737_v29, %v669_v36  ;;  %v738_v44 = vmul.f32 %v1402_v22, %v1545_v16  ;;  %v570_v49 = vadd.f32 %v538_v3, %v469_v41  ;;  %v370_v51 = vadd.f32 %v338_v47, %v238_v21  ;;  %v1342_v36 = vld [vmem:[%s1530_s22 + $0x90] sm:$0xff] }
  0x2f   : > { %v1069_v43 = vadd.f32 %v1037_v27, %v969_v38  ;;  %v539_v54 = vmul.f32 %v1339_v32, %v1538_v11  ;;  %v839_v45 = vmul.f32 %v1340_v50, %v1547_v17  ;;  %v639_v56 = vmul.f32 %v1371_v39, %v1543_v15 }
  0x30   : > { %v870_v55 = vadd.f32 %v838_v37, %v769_v34  ;;  %v239_v46 = vmul.f32 %v1338_v2, %v1532_v8  ;;  %v670_v57 = vadd.f32 %v638_v18, %v570_v49  ;;  %v470_v62 = vadd.f32 %v438_v33, %v370_v51  ;;  %v1374_v33 = vld [vmem:[%s1530_s22 + $0x91] sm:$0xff] }
  0x31   : > { %1102 = vst.msk [vmem:[%s1614_s26 + $0x20] sm:$0xff] %vm1097_vm0, %v1069_v43  ;;  %v339_v60 = vmul.f32 %v1370_v63, %v1534_v9  ;;  %v439_v0 = vmul.f32 %v1402_v22, %v1536_v10  ;;  %v939_v4 = vmul.f32 %v1372_v58, %v1554_v23  ;;  %v1039_v5 = vmul.f32 %v1404_v59, %v1556_v24  ;;  %v1373_v22 = vld [vmem:[%s1530_s22 + $0x81] sm:$0xff]  ;;  %v1406_v34 = vld [vmem:[%s1530_s22 + $0x92] sm:$0xff] }
  0x32   : > { %v970_v1 = vadd.f32 %v938_v42, %v870_v55  ;;  %v739_v6 = vmul.f32 %v1403_v40, %v1545_v16  ;;  %v770_v2 = vadd.f32 %v738_v44, %v670_v57  ;;  %v571_v52 = vadd.f32 %v539_v54, %v470_v62 }
  0x33   : > { %v371_v53 = vadd.f32 %v339_v60, %v239_v46  ;;  %v540_v61 = vmul.f32 %v1340_v50, %v1538_v11  ;;  %v840_v63 = vmul.f32 %v1341_v7, %v1547_v17  ;;  %v640_v13 = vmul.f32 %v1372_v58, %v1543_v15 }
  0x34   : > { %v1070_v12 = vadd.f32 %v1038_v48, %v970_v1  ;;  %v240_v14 = vmul.f32 %v1339_v32, %v1532_v8  ;;  %v871_v19 = vadd.f32 %v839_v45, %v770_v2  ;;  %v671_v20 = vadd.f32 %v639_v56, %v571_v52  ;;  %v1343_v45 = vld [vmem:[%s1530_s22 + $0x98] sm:$0xff] }
  0x35   : > { %v471_v25 = vadd.f32 %v439_v0, %v371_v53  ;;  %v340_v26 = vmul.f32 %v1371_v39, %v1534_v9  ;;  %v940_v27 = vmul.f32 %v1373_v22, %v1554_v23  ;;  %v740_v28 = vmul.f32 %v1404_v59, %v1545_v16  ;;  %v1375_v56 = vld [vmem:[%s1530_s22 + $0x99] sm:$0xff] }
  0x36   : > { %1103 = vst.msk [vmem:[%s1614_s26 + $0x28] sm:$0xff] %vm1097_vm0, %v1070_v12  ;;  %v440_v29 = vmul.f32 %v1403_v40, %v1536_v10  ;;  %v541_v30 = vmul.f32 %v1341_v7, %v1538_v11  ;;  %v971_v31 = vadd.f32 %v939_v4, %v871_v19  ;;  %v771_v32 = vadd.f32 %v739_v6, %v671_v20  ;;  %v1407_v4 = vld [vmem:[%s1530_s22 + $0x9a] sm:$0xff] }
  0x37   : > { %v572_v3 = vadd.f32 %v540_v61, %v471_v25  ;;  %v372_v37 = vadd.f32 %v340_v26, %v240_v14  ;;  %v1040_v18 = vmul.f32 %v1405_v35, %v1556_v24  ;;  %v841_v21 = vmul.f32 %v1342_v36, %v1547_v17 }
  0x38   : > { %v641_v38 = vmul.f32 %v1373_v22, %v1543_v15  ;;  %v241_v39 = vmul.f32 %v1340_v50, %v1532_v8  ;;  %v1071_v40 = vadd.f32 %v1039_v5, %v971_v31  ;;  %v872_v41 = vadd.f32 %v840_v63, %v771_v32 }
  0x39   : > { %v672_v47 = vadd.f32 %v640_v13, %v572_v3  ;;  %v472_v42 = vadd.f32 %v440_v29, %v372_v37  ;;  %v941_v48 = vmul.f32 %v1374_v33, %v1554_v23  ;;  %v1041_v44 = vmul.f32 %v1406_v34, %v1556_v24  ;;  %v1376_v29 = vld [vmem:[%s1530_s22 + $0xa9] sm:$0xff] }
  0x3a   : > { %v341_v43 = vmul.f32 %v1372_v58, %v1534_v9  ;;  %v441_v49 = vmul.f32 %v1404_v59, %v1536_v10  ;;  %1104 = vst.msk [vmem:[%s1614_s26 + $0x30] sm:$0xff] %vm1097_vm0, %v1071_v40  ;;  %v972_v50 = vadd.f32 %v940_v27, %v872_v41  ;;  %v741_v55 = vmul.f32 %v1405_v35, %v1545_v16 }
  0x3b   : > { %v772_v51 = vadd.f32 %v740_v28, %v672_v47  ;;  %v573_v54 = vadd.f32 %v541_v30, %v472_v42  ;;  %v842_v46 = vmul.f32 %v1343_v45, %v1547_v17  ;;  %v942_v57 = vmul.f32 %v1375_v56, %v1554_v23  ;;  %v1408_v30 = vld [vmem:[%s1530_s22 + $0xaa] sm:$0xff] }
  0x3c   : > { %v373_v62 = vadd.f32 %v341_v43, %v241_v39  ;;  %v542_v58 = vmul.f32 %v1342_v36, %v1538_v11  ;;  %v1072_v59 = vadd.f32 %v1040_v18, %v972_v50  ;;  %v242_v1 = vmul.f32 %v1341_v7, %v1532_v8  ;;  %v1344_v7 = vld [vmem:[%s1530_s22 + $0xa8] sm:$0xff]  ;;  %v1345_v39 = vld [vmem:[%s1530_s22 + $0xb0] sm:$0xff] }
  0x3d   : > { %v873_v60 = vadd.f32 %v841_v21, %v772_v51  ;;  %v673_v0 = vadd.f32 %v641_v38, %v573_v54  ;;  %v642_v6 = vmul.f32 %v1374_v33, %v1543_v15  ;;  %v342_v2 = vmul.f32 %v1373_v22, %v1534_v9  ;;  %v1377_v43 = vld [vmem:[%s1530_s22 + $0xb1] sm:$0xff] }
  0x3e   : > { %v473_v5 = vadd.f32 %v441_v49, %v373_v62  ;;  %v442_v52 = vmul.f32 %v1405_v35, %v1536_v10  ;;  %1105 = vst.msk [vmem:[%s1614_s26 + $0x38] sm:$0xff] %vm1097_vm0, %v1072_v59  ;;  %v1042_v12 = vmul.f32 %v1407_v4, %v1556_v24  ;;  %v742_v63 = vmul.f32 %v1406_v34, %v1545_v16  ;;  %v1409_v62 = vld [vmem:[%s1530_s22 + $0xb2] sm:$0xff]  ;;  %v1346_v59 = vld [vmem:[%s1530_s22 + $0xc0] sm:$0xff] }
  0x3f   : > { %v973_v53 = vadd.f32 %v941_v48, %v873_v60  ;;  %v773_v61 = vadd.f32 %v741_v55, %v673_v0  ;;  %v843_v14 = vmul.f32 %v1344_v7, %v1547_v17  ;;  %v374_v19 = vadd.f32 %v342_v2, %v242_v1 }
  0x40   : > { %v574_v13 = vadd.f32 %v542_v58, %v473_v5  ;;  %v543_v20 = vmul.f32 %v1343_v45, %v1538_v11  ;;  %v643_v26 = vmul.f32 %v1375_v56, %v1543_v15  ;;  %v243_v27 = vmul.f32 %v1342_v36, %v1532_v8 }
  0x41   : > { %v1073_v22 = vadd.f32 %v1041_v44, %v973_v53  ;;  %v874_v25 = vadd.f32 %v842_v46, %v773_v61  ;;  %v474_v31 = vadd.f32 %v442_v52, %v374_v19  ;;  %v343_v32 = vmul.f32 %v1374_v33, %v1534_v9  ;;  %v1378_v52 = vld [vmem:[%s1530_s22 + $0xc1] sm:$0xff] }
  0x42   : > { %v674_v28 = vadd.f32 %v642_v6, %v574_v13  ;;  %v443_v35 = vmul.f32 %v1406_v34, %v1536_v10  ;;  %v943_v37 = vmul.f32 %v1376_v29, %v1554_v23  ;;  %v1043_v18 = vmul.f32 %v1408_v30, %v1556_v24  ;;  %v1410_v53 = vld [vmem:[%s1530_s22 + $0xc2] sm:$0xff] }
  0x43   : > { %1106 = vst.msk [vmem:[%s1614_s26 + $0x40] sm:$0xff] %vm1097_vm0, %v1073_v22  ;;  %v974_v3 = vadd.f32 %v942_v57, %v874_v25  ;;  %v743_v21 = vmul.f32 %v1407_v4, %v1545_v16  ;;  %v575_v38 = vadd.f32 %v543_v20, %v474_v31  ;;  %v375_v40 = vadd.f32 %v343_v32, %v243_v27  ;;  %v1347_v25 = vld [vmem:[%s1530_s22 + $0xc8] sm:$0xff] }
  0x44   : > { %v774_v36 = vadd.f32 %v742_v63, %v674_v28  ;;  %v544_v41 = vmul.f32 %v1344_v7, %v1538_v11  ;;  %v844_v33 = vmul.f32 %v1345_v39, %v1547_v17  ;;  %v644_v34 = vmul.f32 %v1376_v29, %v1543_v15 }
  0x45   : > { %v1074_v47 = vadd.f32 %v1042_v12, %v974_v3  ;;  %v244_v42 = vmul.f32 %v1343_v45, %v1532_v8  ;;  %v675_v44 = vadd.f32 %v643_v26, %v575_v38  ;;  %v475_v49 = vadd.f32 %v443_v35, %v375_v40  ;;  %v1379_v26 = vld [vmem:[%s1530_s22 + $0xc9] sm:$0xff] }
  0x46   : > { %v875_v48 = vadd.f32 %v843_v14, %v774_v36  ;;  %v344_v50 = vmul.f32 %v1375_v56, %v1534_v9  ;;  %v944_v51 = vmul.f32 %v1377_v43, %v1554_v23  ;;  %v744_v54 = vmul.f32 %v1408_v30, %v1545_v16 }
  0x47   : > { %1107 = vst.msk [vmem:[%s1614_s26 + $0x48] sm:$0xff] %vm1097_vm0, %v1074_v47  ;;  %v444_v55 = vmul.f32 %v1407_v4, %v1536_v10  ;;  %v545_v46 = vmul.f32 %v1345_v39, %v1538_v11  ;;  %v775_v45 = vadd.f32 %v743_v21, %v675_v44  ;;  %v576_v58 = vadd.f32 %v544_v41, %v475_v49 }
  0x48   : > { %v975_v57 = vadd.f32 %v943_v37, %v875_v48  ;;  %v376_v60 = vadd.f32 %v344_v50, %v244_v42  ;;  %v1044_v56 = vmul.f32 %v1409_v62, %v1556_v24  ;;  %v845_v0 = vmul.f32 %v1346_v59, %v1547_v17  ;;  %v1411_v37 = vld [vmem:[%s1530_s22 + $0xca] sm:$0xff] }
  0x49   : > { %v645_v1 = vmul.f32 %v1377_v43, %v1543_v15  ;;  %v245_v5 = vmul.f32 %v1344_v7, %v1532_v8  ;;  %v876_v6 = vadd.f32 %v844_v33, %v775_v45  ;;  %v676_v2 = vadd.f32 %v644_v34, %v576_v58 }
  0x4a   : > { %v1075_v4 = vadd.f32 %v1043_v18, %v975_v57  ;;  %v476_v61 = vadd.f32 %v444_v55, %v376_v60  ;;  %v945_v12 = vmul.f32 %v1378_v52, %v1554_v23  ;;  %v1045_v63 = vmul.f32 %v1410_v53, %v1556_v24  ;;  %v1380_v55 = vld [vmem:[%s1530_s22 + $0xd9] sm:$0xff] }
  0x4b   : > { %v345_v13 = vmul.f32 %v1376_v29, %v1534_v9  ;;  %v445_v14 = vmul.f32 %v1408_v30, %v1536_v10  ;;  %v976_v7 = vadd.f32 %v944_v51, %v876_v6  ;;  %v776_v19 = vadd.f32 %v744_v54, %v676_v2 }
  0x4c   : > { %1108 = vst.msk [vmem:[%s1614_s26 + $0x50] sm:$0xff] %vm1097_vm0, %v1075_v4  ;;  %v577_v20 = vadd.f32 %v545_v46, %v476_v61  ;;  %v745_v22 = vmul.f32 %v1409_v62, %v1545_v16  ;;  %v846_v27 = vmul.f32 %v1347_v25, %v1547_v17  ;;  %v946_v28 = vmul.f32 %v1379_v26, %v1554_v23  ;;  %v1412_v46 = vld [vmem:[%s1530_s22 + $0xda] sm:$0xff] }
  0x4d   : > { %v377_v31 = vadd.f32 %v345_v13, %v245_v5  ;;  %v546_v29 = vmul.f32 %v1346_v59, %v1538_v11  ;;  %v1076_v30 = vadd.f32 %v1044_v56, %v976_v7  ;;  %v877_v32 = vadd.f32 %v845_v0, %v776_v19  ;;  %v1349_v5 = vld [vmem:[%s1530_s22 + $0xe0] sm:$0xff] }
  0x4e   : > { %v677_v35 = vadd.f32 %v645_v1, %v577_v20  ;;  %v246_v3 = vmul.f32 %v1345_v39, %v1532_v8  ;;  %v646_v21 = vmul.f32 %v1378_v52, %v1543_v15  ;;  %v346_v36 = vmul.f32 %v1377_v43, %v1534_v9  ;;  %v1348_v39 = vld [vmem:[%s1530_s22 + $0xd8] sm:$0xff]  ;;  %v1381_v13 = vld [vmem:[%s1530_s22 + $0xe1] sm:$0xff] }
  0x4f   : > { %v477_v18 = vadd.f32 %v445_v14, %v377_v31  ;;  %v446_v38 = vmul.f32 %v1409_v62, %v1536_v10  ;;  %1109 = vst.msk [vmem:[%s1614_s26 + $0x58] sm:$0xff] %vm1097_vm0, %v1076_v30  ;;  %v977_v40 = vadd.f32 %v945_v12, %v877_v32  ;;  %v1046_v47 = vmul.f32 %v1411_v37, %v1556_v24  ;;  %v1413_v31 = vld [vmem:[%s1530_s22 + $0xe2] sm:$0xff]  ;;  %v1350_v30 = vld [vmem:[%s1530_s22 + $0xf0] sm:$0xff] }
  0x50   : > { %v777_v41 = vadd.f32 %v745_v22, %v677_v35  ;;  %v746_v33 = vmul.f32 %v1410_v53, %v1545_v16  ;;  %v847_v42 = vmul.f32 %v1348_v39, %v1547_v17  ;;  %v378_v48 = vadd.f32 %v346_v36, %v246_v3 }
  0x51   : > { %v578_v34 = vadd.f32 %v546_v29, %v477_v18  ;;  %v547_v44 = vmul.f32 %v1347_v25, %v1538_v11  ;;  %v1077_v43 = vadd.f32 %v1045_v63, %v977_v40  ;;  %v647_v50 = vmul.f32 %v1379_v26, %v1543_v15  ;;  %v1414_v40 = vld [vmem:[%s1530_s22 + $0xf2] sm:$0xff] }
  0x52   : > { %v878_v49 = vadd.f32 %v846_v27, %v777_v41  ;;  %v247_v51 = vmul.f32 %v1346_v59, %v1532_v8  ;;  %v478_v57 = vadd.f32 %v446_v38, %v378_v48  ;;  %v347_v45 = vmul.f32 %v1378_v52, %v1534_v9  ;;  %v1382_v38 = vld [vmem:[%s1530_s22 + $0xf1] sm:$0xff] }
  0x53   : > { %v678_v54 = vadd.f32 %v646_v21, %v578_v34  ;;  %v447_v62 = vmul.f32 %v1410_v53, %v1536_v10  ;;  %1110 = vst.msk [vmem:[%s1614_s26 + $0x60] sm:$0xff] %vm1097_vm0, %v1077_v43  ;;  %v947_v60 = vmul.f32 %v1380_v55, %v1554_v23  ;;  %v1047_v56 = vmul.f32 %v1412_v46, %v1556_v24 }
  0x54   : > { %v978_v58 = vadd.f32 %v946_v28, %v878_v49  ;;  %v747_v0 = vmul.f32 %v1411_v37, %v1545_v16  ;;  %v579_v1 = vadd.f32 %v547_v44, %v478_v57  ;;  %v379_v4 = vadd.f32 %v347_v45, %v247_v51  ;;  %v1351_v49 = vld [vmem:[%s1530_s22 + $0xf8] sm:$0xff] }
  0x55   : > { %v778_v59 = vadd.f32 %v746_v33, %v678_v54  ;;  %v548_v6 = vmul.f32 %v1348_v39, %v1538_v11  ;;  %v848_v52 = vmul.f32 %v1349_v5, %v1547_v17  ;;  %v648_v53 = vmul.f32 %v1380_v55, %v1543_v15 }
  0x56   : > { %v1078_v2 = vadd.f32 %v1046_v47, %v978_v58  ;;  %v248_v61 = vmul.f32 %v1347_v25, %v1532_v8  ;;  %v679_v63 = vadd.f32 %v647_v50, %v579_v1  ;;  %v479_v14 = vadd.f32 %v447_v62, %v379_v4  ;;  %v1383_v50 = vld [vmem:[%s1530_s22 + $0xf9] sm:$0xff] }
  0x57   : > { %v879_v12 = vadd.f32 %v847_v42, %v778_v59  ;;  %v348_v7 = vmul.f32 %v1379_v26, %v1534_v9  ;;  %v948_v19 = vmul.f32 %v1381_v13, %v1554_v23  ;;  %v748_v20 = vmul.f32 %v1412_v46, %v1545_v16 }
  0x58   : > { %1111 = vst.msk [vmem:[%s1614_s26 + $0x68] sm:$0xff] %vm1097_vm0, %v1078_v2  ;;  %v448_v22 = vmul.f32 %v1411_v37, %v1536_v10  ;;  %v549_v27 = vmul.f32 %v1349_v5, %v1538_v11  ;;  %v779_v25 = vadd.f32 %v747_v0, %v679_v63  ;;  %v580_v29 = vadd.f32 %v548_v6, %v479_v14 }
  0x59   : > { %v979_v28 = vadd.f32 %v947_v60, %v879_v12  ;;  %v380_v32 = vadd.f32 %v348_v7, %v248_v61  ;;  %v1048_v26 = vmul.f32 %v1413_v31, %v1556_v24  ;;  %v849_v35 = vmul.f32 %v1350_v30, %v1547_v17  ;;  %v1415_v60 = vld [vmem:[%s1530_s22 + $0xfa] sm:$0xff] }
  0x5a   : > { %v649_v3 = vmul.f32 %v1381_v13, %v1543_v15  ;;  %v249_v18 = vmul.f32 %v1348_v39, %v1532_v8  ;;  %v880_v21 = vadd.f32 %v848_v52, %v779_v25  ;;  %v680_v36 = vadd.f32 %v648_v53, %v580_v29 }
  0x5b   : > { %v1079_v37 = vadd.f32 %v1047_v56, %v979_v28  ;;  %v480_v41 = vadd.f32 %v448_v22, %v380_v32  ;;  %v949_v47 = vmul.f32 %v1382_v38, %v1554_v23  ;;  %v1049_v33 = vmul.f32 %v1414_v40, %v1556_v24  ;;  %v1384_v22 = vld [vmem:[%s1530_s22 + $0x109] sm:$0xff] }
  0x5c   : > { %v349_v34 = vmul.f32 %v1380_v55, %v1534_v9  ;;  %v449_v42 = vmul.f32 %v1412_v46, %v1536_v10  ;;  %v980_v39 = vadd.f32 %v948_v19, %v880_v21  ;;  %v780_v48 = vadd.f32 %v748_v20, %v680_v36 }
  0x5d   : > { %1112 = vst.msk [vmem:[%s1614_s26 + $0x70] sm:$0xff] %vm1097_vm0, %v1079_v37  ;;  %v581_v44 = vadd.f32 %v549_v27, %v480_v41  ;;  %v749_v43 = vmul.f32 %v1413_v31, %v1545_v16  ;;  %v850_v51 = vmul.f32 %v1351_v49, %v1547_v17  ;;  %v950_v54 = vmul.f32 %v1383_v50, %v1554_v23  ;;  %v1416_v27 = vld [vmem:[%s1530_s22 + $0x10a] sm:$0xff] }
  0x5e   : > { %v381_v57 = vadd.f32 %v349_v34, %v249_v18  ;;  %v550_v55 = vmul.f32 %v1350_v30, %v1538_v11  ;;  %v1080_v46 = vadd.f32 %v1048_v26, %v980_v39  ;;  %v881_v45 = vadd.f32 %v849_v35, %v780_v48  ;;  %v1353_v18 = vld [vmem:[%s1530_s22 + $0x110] sm:$0xff] }
  0x5f   : > { %v681_v62 = vadd.f32 %v649_v3, %v581_v44  ;;  %v250_v58 = vmul.f32 %v1349_v5, %v1532_v8  ;;  %v650_v0 = vmul.f32 %v1382_v38, %v1543_v15  ;;  %v350_v59 = vmul.f32 %v1381_v13, %v1534_v9  ;;  %v1352_v5 = vld [vmem:[%s1530_s22 + $0x108] sm:$0xff]  ;;  %v1385_v34 = vld [vmem:[%s1530_s22 + $0x111] sm:$0xff] }
  0x60   : > { %v481_v56 = vadd.f32 %v449_v42, %v381_v57  ;;  %v450_v1 = vmul.f32 %v1413_v31, %v1536_v10  ;;  %1113 = vst.msk [vmem:[%s1614_s26 + $0x78] sm:$0xff] %vm1097_vm0, %v1080_v46  ;;  %v981_v4 = vadd.f32 %v949_v47, %v881_v45  ;;  %v1050_v2 = vmul.f32 %v1415_v60, %v1556_v24  ;;  %v1417_v57 = vld [vmem:[%s1530_s22 + $0x112] sm:$0xff]  ;;  %v1354_v46 = vld [vmem:[%s1530_s22 + $0x120] sm:$0xff] }
  0x61   : > { %v781_v6 = vadd.f32 %v749_v43, %v681_v62  ;;  %v750_v52 = vmul.f32 %v1414_v40, %v1545_v16  ;;  %v851_v61 = vmul.f32 %v1352_v5, %v1547_v17  ;;  %v382_v12 = vadd.f32 %v350_v59, %v250_v58 }
  0x62   : > { %v582_v53 = vadd.f32 %v550_v55, %v481_v56  ;;  %v551_v63 = vmul.f32 %v1351_v49, %v1538_v11  ;;  %v1081_v13 = vadd.f32 %v1049_v33, %v981_v4  ;;  %v651_v7 = vmul.f32 %v1383_v50, %v1543_v15  ;;  %v1418_v4 = vld [vmem:[%s1530_s22 + $0x122] sm:$0xff] }
  0x63   : > { %v882_v14 = vadd.f32 %v850_v51, %v781_v6  ;;  %v251_v19 = vmul.f32 %v1350_v30, %v1532_v8  ;;  %v482_v28 = vadd.f32 %v450_v1, %v382_v12  ;;  %v351_v25 = vmul.f32 %v1382_v38, %v1534_v9  ;;  %v1386_v1 = vld [vmem:[%s1530_s22 + $0x121] sm:$0xff] }
  0x64   : > { %v682_v20 = vadd.f32 %v650_v0, %v582_v53  ;;  %v451_v31 = vmul.f32 %v1414_v40, %v1536_v10  ;;  %1114 = vst.msk [vmem:[%s1614_s26 + $0x80] sm:$0xff] %vm1097_vm0, %v1081_v13  ;;  %v951_v32 = vmul.f32 %v1384_v22, %v1554_v23  ;;  %v1051_v26 = vmul.f32 %v1416_v27, %v1556_v24 }
  0x65   : > { %v982_v29 = vadd.f32 %v950_v54, %v882_v14  ;;  %v751_v35 = vmul.f32 %v1415_v60, %v1545_v16  ;;  %v583_v3 = vadd.f32 %v551_v63, %v482_v28  ;;  %v383_v37 = vadd.f32 %v351_v25, %v251_v19  ;;  %v1355_v14 = vld [vmem:[%s1530_s22 + $0x128] sm:$0xff] }
  0x66   : > { %v782_v30 = vadd.f32 %v750_v52, %v682_v20  ;;  %v552_v21 = vmul.f32 %v1352_v5, %v1538_v11  ;;  %v852_v38 = vmul.f32 %v1353_v18, %v1547_v17  ;;  %v652_v40 = vmul.f32 %v1384_v22, %v1543_v15 }
  0x67   : > { %v1082_v36 = vadd.f32 %v1050_v2, %v982_v29  ;;  %v252_v41 = vmul.f32 %v1351_v49, %v1532_v8  ;;  %v683_v33 = vadd.f32 %v651_v7, %v583_v3  ;;  %v483_v42 = vadd.f32 %v451_v31, %v383_v37  ;;  %v1387_v7 = vld [vmem:[%s1530_s22 + $0x129] sm:$0xff] }
  0x68   : > { %v883_v47 = vadd.f32 %v851_v61, %v782_v30  ;;  %v352_v39 = vmul.f32 %v1383_v50, %v1534_v9  ;;  %v952_v48 = vmul.f32 %v1385_v34, %v1554_v23  ;;  %v752_v44 = vmul.f32 %v1416_v27, %v1545_v16 }
  0x69   : > { %1115 = vst.msk [vmem:[%s1614_s26 + $0x88] sm:$0xff] %vm1097_vm0, %v1082_v36  ;;  %v452_v43 = vmul.f32 %v1415_v60, %v1536_v10  ;;  %v553_v51 = vmul.f32 %v1353_v18, %v1538_v11  ;;  %v783_v49 = vadd.f32 %v751_v35, %v683_v33  ;;  %v584_v55 = vadd.f32 %v552_v21, %v483_v42 }
  0x6a   : > { %v983_v54 = vadd.f32 %v951_v32, %v883_v47  ;;  %v384_v45 = vadd.f32 %v352_v39, %v252_v41  ;;  %v1052_v50 = vmul.f32 %v1417_v57, %v1556_v24  ;;  %v853_v62 = vmul.f32 %v1354_v46, %v1547_v17  ;;  %v1419_v32 = vld [vmem:[%s1530_s22 + $0x12a] sm:$0xff] }
  0x6b   : > { %v653_v58 = vmul.f32 %v1385_v34, %v1543_v15  ;;  %v253_v56 = vmul.f32 %v1352_v5, %v1532_v8  ;;  %v884_v0 = vadd.f32 %v852_v38, %v783_v49  ;;  %v684_v59 = vadd.f32 %v652_v40, %v584_v55 }
  0x6c   : > { %v1083_v60 = vadd.f32 %v1051_v26, %v983_v54  ;;  %v484_v6 = vadd.f32 %v452_v43, %v384_v45  ;;  %v953_v2 = vmul.f32 %v1386_v1, %v1554_v23  ;;  %v1053_v52 = vmul.f32 %v1418_v4, %v1556_v24  ;;  %v1388_v43 = vld [vmem:[%s1530_s22 + $0x139] sm:$0xff] }
  0x6d   : > { %v353_v53 = vmul.f32 %v1384_v22, %v1534_v9  ;;  %v453_v61 = vmul.f32 %v1416_v27, %v1536_v10  ;;  %v984_v5 = vadd.f32 %v952_v48, %v884_v0  ;;  %v784_v12 = vadd.f32 %v752_v44, %v684_v59 }
  0x6e   : > { %1116 = vst.msk [vmem:[%s1614_s26 + $0x90] sm:$0xff] %vm1097_vm0, %v1083_v60  ;;  %v585_v63 = vadd.f32 %v553_v51, %v484_v6  ;;  %v753_v13 = vmul.f32 %v1417_v57, %v1545_v16  ;;  %v854_v19 = vmul.f32 %v1355_v14, %v1547_v17  ;;  %v954_v20 = vmul.f32 %v1387_v7, %v1554_v23  ;;  %v1420_v51 = vld [vmem:[%s1530_s22 + $0x13a] sm:$0xff] }
  0x6f   : > { %v385_v28 = vadd.f32 %v353_v53, %v253_v56  ;;  %v554_v22 = vmul.f32 %v1354_v46, %v1538_v11  ;;  %v1084_v27 = vadd.f32 %v1052_v50, %v984_v5  ;;  %v885_v25 = vadd.f32 %v853_v62, %v784_v12  ;;  %v1357_v56 = vld [vmem:[%s1530_s22 + $0x140] sm:$0xff] }
  0x70   : > { %v685_v31 = vadd.f32 %v653_v58, %v585_v63  ;;  %v254_v29 = vmul.f32 %v1353_v18, %v1532_v8  ;;  %v654_v35 = vmul.f32 %v1386_v1, %v1543_v15  ;;  %v354_v30 = vmul.f32 %v1385_v34, %v1534_v9  ;;  %v1356_v18 = vld [vmem:[%s1530_s22 + $0x138] sm:$0xff]  ;;  %v1389_v53 = vld [vmem:[%s1530_s22 + $0x141] sm:$0xff] }
  0x71   : > { %v485_v26 = vadd.f32 %v453_v61, %v385_v28  ;;  %v454_v3 = vmul.f32 %v1417_v57, %v1536_v10  ;;  %1117 = vst.msk [vmem:[%s1614_s26 + $0x98] sm:$0xff] %vm1097_vm0, %v1084_v27  ;;  %v985_v37 = vadd.f32 %v953_v2, %v885_v25  ;;  %v1054_v36 = vmul.f32 %v1419_v32, %v1556_v24  ;;  %v1421_v28 = vld [vmem:[%s1530_s22 + $0x142] sm:$0xff]  ;;  %v1358_v27 = vld [vmem:[%s1530_s22 + $0x150] sm:$0xff] }
  0x72   : > { %v785_v21 = vadd.f32 %v753_v13, %v685_v31  ;;  %v754_v38 = vmul.f32 %v1418_v4, %v1545_v16  ;;  %v855_v41 = vmul.f32 %v1356_v18, %v1547_v17  ;;  %v386_v47 = vadd.f32 %v354_v30, %v254_v29 }
  0x73   : > { %v586_v40 = vadd.f32 %v554_v22, %v485_v26  ;;  %v555_v33 = vmul.f32 %v1355_v14, %v1538_v11  ;;  %v1085_v34 = vadd.f32 %v1053_v52, %v985_v37  ;;  %v655_v39 = vmul.f32 %v1387_v7, %v1543_v15  ;;  %v1422_v37 = vld [vmem:[%s1530_s22 + $0x152] sm:$0xff] }
  0x74   : > { %v886_v42 = vadd.f32 %v854_v19, %v785_v21  ;;  %v255_v48 = vmul.f32 %v1354_v46, %v1532_v8  ;;  %v486_v54 = vadd.f32 %v454_v3, %v386_v47  ;;  %v355_v49 = vmul.f32 %v1386_v1, %v1534_v9  ;;  %v1390_v3 = vld [vmem:[%s1530_s22 + $0x151] sm:$0xff] }
  0x75   : > { %v686_v44 = vadd.f32 %v654_v35, %v586_v40  ;;  %v455_v57 = vmul.f32 %v1418_v4, %v1536_v10  ;;  %1118 = vst.msk [vmem:[%s1614_s26 + $0xa0] sm:$0xff] %vm1097_vm0, %v1085_v34  ;;  %v955_v45 = vmul.f32 %v1388_v43, %v1554_v23  ;;  %v1055_v50 = vmul.f32 %v1420_v51, %v1556_v24 }
  0x76   : > { %v986_v55 = vadd.f32 %v954_v20, %v886_v42  ;;  %v755_v62 = vmul.f32 %v1419_v32, %v1545_v16  ;;  %v587_v58 = vadd.f32 %v555_v33, %v486_v54  ;;  %v387_v60 = vadd.f32 %v355_v49, %v255_v48  ;;  %v1359_v42 = vld [vmem:[%s1530_s22 + $0x158] sm:$0xff] }
  0x77   : > { %v786_v46 = vadd.f32 %v754_v38, %v686_v44  ;;  %v556_v0 = vmul.f32 %v1356_v18, %v1538_v11  ;;  %v856_v1 = vmul.f32 %v1357_v56, %v1547_v17  ;;  %v656_v4 = vmul.f32 %v1388_v43, %v1543_v15 }
  0x78   : > { %v1086_v59 = vadd.f32 %v1054_v36, %v986_v55  ;;  %v256_v6 = vmul.f32 %v1355_v14, %v1532_v8  ;;  %v687_v52 = vadd.f32 %v655_v39, %v587_v58  ;;  %v487_v61 = vadd.f32 %v455_v57, %v387_v60  ;;  %v1391_v39 = vld [vmem:[%s1530_s22 + $0x159] sm:$0xff] }
  0x79   : > { %v887_v2 = vadd.f32 %v855_v41, %v786_v46  ;;  %v356_v5 = vmul.f32 %v1387_v7, %v1534_v9  ;;  %v956_v12 = vmul.f32 %v1389_v53, %v1554_v23  ;;  %v756_v63 = vmul.f32 %v1420_v51, %v1545_v16 }
  0x7a   : > { %1119 = vst.msk [vmem:[%s1614_s26 + $0xa8] sm:$0xff] %vm1097_vm0, %v1086_v59  ;;  %v456_v13 = vmul.f32 %v1419_v32, %v1536_v10  ;;  %v557_v19 = vmul.f32 %v1357_v56, %v1538_v11  ;;  %v787_v14 = vadd.f32 %v755_v62, %v687_v52  ;;  %v588_v22 = vadd.f32 %v556_v0, %v487_v61 }
  0x7b   : > { %v987_v20 = vadd.f32 %v955_v45, %v887_v2  ;;  %v388_v25 = vadd.f32 %v356_v5, %v256_v6  ;;  %v1056_v7 = vmul.f32 %v1421_v28, %v1556_v24  ;;  %v857_v31 = vmul.f32 %v1358_v27, %v1547_v17  ;;  %v1423_v45 = vld [vmem:[%s1530_s22 + $0x15a] sm:$0xff] }
  0x7c   : > { %v657_v29 = vmul.f32 %v1389_v53, %v1543_v15  ;;  %v257_v26 = vmul.f32 %v1356_v18, %v1532_v8  ;;  %v888_v35 = vadd.f32 %v856_v1, %v787_v14  ;;  %v688_v30 = vadd.f32 %v656_v4, %v588_v22 }
  0x7d   : > { %v1087_v32 = vadd.f32 %v1055_v50, %v987_v20  ;;  %v488_v21 = vadd.f32 %v456_v13, %v388_v25  ;;  %v957_v36 = vmul.f32 %v1390_v3, %v1554_v23  ;;  %v1057_v38 = vmul.f32 %v1422_v37, %v1556_v24  ;;  %v1392_v13 = vld [vmem:[%s1530_s22 + $0x169] sm:$0xff] }
  0x7e   : > { %v357_v40 = vmul.f32 %v1388_v43, %v1534_v9  ;;  %v457_v41 = vmul.f32 %v1420_v51, %v1536_v10  ;;  %v988_v18 = vadd.f32 %v956_v12, %v888_v35  ;;  %v788_v47 = vadd.f32 %v756_v63, %v688_v30 }
  0x7f   : > { %1120 = vst.msk [vmem:[%s1614_s26 + $0xb0] sm:$0xff] %vm1097_vm0, %v1087_v32  ;;  %v589_v33 = vadd.f32 %v557_v19, %v488_v21  ;;  %v757_v34 = vmul.f32 %v1421_v28, %v1545_v16  ;;  %v858_v48 = vmul.f32 %v1359_v42, %v1547_v17  ;;  %v958_v44 = vmul.f32 %v1391_v39, %v1554_v23  ;;  %v1424_v19 = vld [vmem:[%s1530_s22 + $0x16a] sm:$0xff] }
  0x80   : > { %v389_v54 = vadd.f32 %v357_v40, %v257_v26  ;;  %v558_v43 = vmul.f32 %v1358_v27, %v1538_v11  ;;  %v1088_v51 = vadd.f32 %v1056_v7, %v988_v18  ;;  %v889_v49 = vadd.f32 %v857_v31, %v788_v47  ;;  %v1361_v26 = vld [vmem:[%s1530_s22 + $0x170] sm:$0xff] }
  0x81   : > { %v689_v57 = vadd.f32 %v657_v29, %v589_v33  ;;  %v258_v55 = vmul.f32 %v1357_v56, %v1532_v8  ;;  %v658_v62 = vmul.f32 %v1390_v3, %v1543_v15  ;;  %v358_v46 = vmul.f32 %v1389_v53, %v1534_v9  ;;  %v1360_v56 = vld [vmem:[%s1530_s22 + $0x168] sm:$0xff]  ;;  %v1393_v40 = vld [vmem:[%s1530_s22 + $0x171] sm:$0xff] }
  0x82   : > { %v489_v50 = vadd.f32 %v457_v41, %v389_v54  ;;  %v458_v58 = vmul.f32 %v1421_v28, %v1536_v10  ;;  %1121 = vst.msk [vmem:[%s1614_s26 + $0xb8] sm:$0xff] %vm1097_vm0, %v1088_v51  ;;  %v989_v60 = vadd.f32 %v957_v36, %v889_v49  ;;  %v1058_v59 = vmul.f32 %v1423_v45, %v1556_v24  ;;  %v1362_v51 = vld [vmem:[%s1530_s22 + $0x180] sm:$0xff] }
  0x83   : > { %v789_v0 = vadd.f32 %v757_v34, %v689_v57  ;;  %v758_v1 = vmul.f32 %v1422_v37, %v1545_v16  ;;  %v859_v6 = vmul.f32 %v1360_v56, %v1547_v17  ;;  %v390_v2 = vadd.f32 %v358_v46, %v258_v55 }
  0x84   : > { %v590_v4 = vadd.f32 %v558_v43, %v489_v50  ;;  %v559_v52 = vmul.f32 %v1359_v42, %v1538_v11  ;;  %v1089_v53 = vadd.f32 %v1057_v38, %v989_v60  ;;  %v659_v5 = vmul.f32 %v1391_v39, %v1543_v15 }
  0x85   : > { %v890_v61 = vadd.f32 %v858_v48, %v789_v0  ;;  %v259_v12 = vmul.f32 %v1358_v27, %v1532_v8  ;;  %v490_v20 = vadd.f32 %v458_v58, %v390_v2  ;;  %v359_v14 = vmul.f32 %v1390_v3, %v1534_v9  ;;  %v1394_v58 = vld [vmem:[%s1530_s22 + $0x181] sm:$0xff] }
  0x86   : > { %v690_v63 = vadd.f32 %v658_v62, %v590_v4  ;;  %v459_v28 = vmul.f32 %v1422_v37, %v1536_v10  ;;  %1122 = vst.msk [vmem:[%s1614_s26 + $0xc0] sm:$0xff] %vm1097_vm0, %v1089_v53  ;;  %v959_v25 = vmul.f32 %v1392_v13, %v1554_v23  ;;  %v1059_v7 = vmul.f32 %v1424_v19, %v1556_v24  ;;  %v1426_v2 = vld [vmem:[%s1530_s22 + $0x182] sm:$0xff] }
  0x87   : > { %v990_v22 = vadd.f32 %v958_v44, %v890_v61  ;;  %v759_v31 = vmul.f32 %v1423_v45, %v1545_v16  ;;  %v591_v29 = vadd.f32 %v559_v52, %v490_v20  ;;  %v391_v32 = vadd.f32 %v359_v14, %v259_v12  ;;  %v1363_v53 = vld [vmem:[%s1530_s22 + $0x188] sm:$0xff] }
  0x88   : > { %v790_v27 = vadd.f32 %v758_v1, %v690_v63  ;;  %v560_v35 = vmul.f32 %v1360_v56, %v1538_v11  ;;  %v860_v3 = vmul.f32 %v1361_v26, %v1547_v17  ;;  %v660_v37 = vmul.f32 %v1392_v13, %v1543_v15 }
  0x89   : > { %v1090_v30 = vadd.f32 %v1058_v59, %v990_v22  ;;  %v260_v21 = vmul.f32 %v1359_v42, %v1532_v8  ;;  %v691_v38 = vadd.f32 %v659_v5, %v591_v29  ;;  %v491_v41 = vadd.f32 %v459_v28, %v391_v32  ;;  %v1425_v42 = vld [vmem:[%s1530_s22 + $0x172] sm:$0xff]  ;;  %v1395_v28 = vld [vmem:[%s1530_s22 + $0x189] sm:$0xff] }
  0x8a   : > { %v891_v36 = vadd.f32 %v859_v6, %v790_v27  ;;  %v360_v18 = vmul.f32 %v1391_v39, %v1534_v9  ;;  %v960_v47 = vmul.f32 %v1393_v40, %v1554_v23  ;;  %v760_v33 = vmul.f32 %v1424_v19, %v1545_v16 }
  0x8b   : > { %1123 = vst.msk [vmem:[%s1614_s26 + $0xc8] sm:$0xff] %vm1097_vm0, %v1090_v30  ;;  %v460_v34 = vmul.f32 %v1423_v45, %v1536_v10  ;;  %v561_v48 = vmul.f32 %v1361_v26, %v1538_v11  ;;  %v791_v54 = vadd.f32 %v759_v31, %v691_v38  ;;  %v592_v43 = vadd.f32 %v560_v35, %v491_v41  ;;  %v1364_v35 = vld [vmem:[%s1530_s22 + $0x198] sm:$0xff]  ;;  %v1427_v30 = vld [vmem:[%s1530_s22 + $0x18a] sm:$0xff] }
  0x8c   : > { %v991_v44 = vadd.f32 %v959_v25, %v891_v36  ;;  %v392_v49 = vadd.f32 %v360_v18, %v260_v21  ;;  %v1060_v39 = vmul.f32 %v1425_v42, %v1556_v24  ;;  %v861_v57 = vmul.f32 %v1362_v51, %v1547_v17  ;;  %v1396_v36 = vld [vmem:[%s1530_s22 + $0x199] sm:$0xff] }
  0x8d   : > { %v661_v55 = vmul.f32 %v1393_v40, %v1543_v15  ;;  %v261_v50 = vmul.f32 %v1360_v56, %v1532_v8  ;;  %v892_v62 = vadd.f32 %v860_v3, %v791_v54  ;;  %v692_v46 = vadd.f32 %v660_v37, %v592_v43  ;;  %v1397_v43 = vld [vmem:[%s1530_s22 + $0x1a1] sm:$0xff] }
  0x8e   : > { %v1091_v45 = vadd.f32 %v1059_v7, %v991_v44  ;;  %v492_v60 = vadd.f32 %v460_v34, %v392_v49  ;;  %v961_v0 = vmul.f32 %v1394_v58, %v1554_v23  ;;  %v361_v59 = vmul.f32 %v1392_v13, %v1534_v9  ;;  %v1365_v34 = vld [vmem:[%s1530_s22 + $0x1a0] sm:$0xff] }
  0x8f   : > { %v461_v1 = vmul.f32 %v1424_v19, %v1536_v10  ;;  %v992_v4 = vadd.f32 %v960_v47, %v892_v62  ;;  %v792_v6 = vadd.f32 %v760_v33, %v692_v46  ;;  %v761_v56 = vmul.f32 %v1425_v42, %v1545_v16  ;;  %v1428_v33 = vld [vmem:[%s1530_s22 + $0x19a] sm:$0xff] }
  0x90   : > { %1124 = vst.msk [vmem:[%s1614_s26 + $0xd0] sm:$0xff] %vm1097_vm0, %v1091_v45  ;;  %v593_v52 = vadd.f32 %v561_v48, %v492_v60  ;;  %v1061_v61 = vmul.f32 %v1426_v2, %v1556_v24  ;;  %v862_v5 = vmul.f32 %v1363_v53, %v1547_v17  ;;  %v393_v12 = vadd.f32 %v361_v59, %v261_v50 }
  0x91   : > { %v562_v63 = vmul.f32 %v1362_v51, %v1538_v11  ;;  %v1092_v13 = vadd.f32 %v1060_v39, %v992_v4  ;;  %v893_v19 = vadd.f32 %v861_v57, %v792_v6  ;;  %v262_v14 = vmul.f32 %v1361_v26, %v1532_v8  ;;  %v1429_v57 = vld [vmem:[%s1530_s22 + $0x1a2] sm:$0xff] }
  0x92   : > { %v693_v20 = vadd.f32 %v661_v55, %v593_v52  ;;  %v493_v22 = vadd.f32 %v461_v1, %v393_v12  ;;  %v662_v25 = vmul.f32 %v1394_v58, %v1543_v15  ;;  %v362_v7 = vmul.f32 %v1393_v40, %v1534_v9 }
  0x93   : > { %v462_v31 = vmul.f32 %v1425_v42, %v1536_v10  ;;  %1125 = vst.msk [vmem:[%s1614_s26 + $0xd8] sm:$0xff] %vm1097_vm0, %v1092_v13  ;;  %v993_v27 = vadd.f32 %v961_v0, %v893_v19  ;;  %v962_v32 = vmul.f32 %v1395_v28, %v1554_v23  ;;  %v762_v26 = vmul.f32 %v1426_v2, %v1545_v16 }
  0x94   : > { %v793_v29 = vadd.f32 %v761_v56, %v693_v20  ;;  %v594_v8 = vadd.f32 %v562_v63, %v493_v22  ;;  %v394_v3 = vadd.f32 %v362_v7, %v262_v14  ;;  %v563_v37 = vmul.f32 %v1363_v53, %v1538_v11 }
  0x95   : > { %v1093_v9 = vadd.f32 %v1061_v61, %v993_v27  ;;  %v1062_v10 = vmul.f32 %v1427_v30, %v1556_v24  ;;  %v863_v40 = vmul.f32 %v1364_v35, %v1547_v17  ;;  %v663_v18 = vmul.f32 %v1395_v28, %v1543_v15 }
  0x96   : > { %v894_v21 = vadd.f32 %v862_v5, %v793_v29  ;;  %v694_v38 = vadd.f32 %v662_v25, %v594_v8  ;;  %v494_v41 = vadd.f32 %v462_v31, %v394_v3  ;;  %v963_v48 = vmul.f32 %v1396_v36, %v1554_v23 }
  0x97   : > { %1126 = vst.msk [vmem:[%s1614_s26 + $0xe0] sm:$0xff] %vm1097_vm0, %v1093_v9  ;;  %v763_v54 = vmul.f32 %v1427_v30, %v1545_v16  ;;  %v1063_v49 = vmul.f32 %v1428_v33, %v1556_v24  ;;  %v864_v39 = vmul.f32 %v1365_v34, %v1547_v17  ;;  %v964_v45 = vmul.f32 %v1397_v43, %v1554_v23 }
  0x98   : > { %v994_v47 = vadd.f32 %v962_v32, %v894_v21  ;;  %v794_v11 = vadd.f32 %v762_v26, %v694_v38  ;;  %v595_v44 = vadd.f32 %v563_v37, %v494_v41  ;;  %v1064_v16 = vmul.f32 %v1429_v57, %v1556_v24 }
  0x9a   : > { %v1094_v42 = vadd.f32 %v1062_v10, %v994_v47  ;;  %v895_v51 = vadd.f32 %v863_v40, %v794_v11  ;;  %v695_v15 = vadd.f32 %v663_v18, %v595_v44 }
  0x9c   : > { %1127 = vst.msk [vmem:[%s1614_s26 + $0xe8] sm:$0xff] %vm1097_vm0, %v1094_v42  ;;  %v995_v55 = vadd.f32 %v963_v48, %v895_v51  ;;  %v795_v50 = vadd.f32 %v763_v54, %v695_v15 }
  0x9e   : > { %v1095_v62 = vadd.f32 %v1063_v49, %v995_v55  ;;  %v896_v46 = vadd.f32 %v864_v39, %v795_v50 }
  0xa0   : > { %1128 = vst.msk [vmem:[%s1614_s26 + $0xf0] sm:$0xff] %vm1097_vm0, %v1095_v62  ;;  %v996_v58 = vadd.f32 %v964_v45, %v896_v46 }
  0xa2   : > { %v1096_v60 = vadd.f32 %v1064_v16, %v996_v58 }
  0xa4   : > { %1129 = vst.msk [vmem:[%s1614_s26 + $0xf8] sm:$0xff] %vm1097_vm0, %v1096_v60 }
  0xa5 PF: > { %s12_s11 = sadd.s32 1, %s1480_s11   ;;  %s2033_s9 = smov %s1476_s10 }
  0xa6   : > { %p9_p5 = scmp.ge.s32.totalorder %s12_s11, 4   ;;  %s2034_s10 = smov %s2036_s12 }
  0xa8   :  { %11 = sbr.rel (!%p9_p5) target bundleno = 2 (0x2), region = 63 }

</bundles_post_ra>
